<compile_context>
chip_gen: v6e
topology: v6e:2x2x1
jax: 0.10.0
libtpu: 0.0.40
codegen_flags: <defaults>
</compile_context>

<pallas_src>
import functools

import jax
import jax.numpy as jnp
from jax.experimental import pallas as pl
from jax.experimental.pallas import tpu as pltpu


def _round_up(x, m):
    return ((x + m - 1) // m) * m


def _pick_tile(P, tile_p):
    """Pick a lane-aligned pixel tile; prefer one that divides P (no tail mask)."""
    if P <= tile_p:
        return P, False
    top = max(128, (tile_p // 128) * 128)
    best = 0
    for t in range(top, 127, -128):
        if P % t == 0:
            best = t
            break
    if best >= max(512, top // 4):
        return best, False
    return top, True       # no good divisor: mask the ragged tail in-kernel


# -----------------------------------------------------------------------------
# Kernel: all per-pixel work on pred_masks (B, Q, H*W) + targets (row & column)
# -----------------------------------------------------------------------------
def _pixel_stats_kernel(masks_ref, tgt_row_ref, tgt_col_ref,
                        hist_ref, inter_ref, ce_ref, cnt_ref, *,
                        num_classes, ignore_index, total_pixels,
                        tiles_per_chunk, mask_tail):
    t_idx = pl.program_id(2)

    @pl.when(t_idx == 0)
    def _init():
        hist_ref[...] = jnp.zeros_like(hist_ref)
        inter_ref[...] = jnp.zeros_like(inter_ref)
        ce_ref[...] = jnp.zeros_like(ce_ref)
        cnt_ref[...] = jnp.zeros_like(cnt_ref)

    x = masks_ref[...].astype(jnp.float32)             # (Q, TP) mask logits
    tgt_row = tgt_row_ref[...]                          # (1, TP) int32 labels
    tgt_col = tgt_col_ref[...]                          # (TP, 1) int32 labels
    Q, TP = x.shape
    Cp = hist_ref.shape[-1]                             # lane-padded class count

    # Sentinel-remap the (TP,1) target column once (cheap) instead of masking the
    # big one-hot: valid in-class pixel -> its class column; any other in-bounds
    # pixel -> column C (gives src_sum for free); OOB tail lane -> no column.
    in_class = ((tgt_col != ignore_index) & (tgt_col >= 0)
                & (tgt_col < num_classes))
    tgt_c = jnp.where(in_class, tgt_col, num_classes)   # (TP, 1)

    if mask_tail:
        # Ragged last tile (fallback path): sanitize out-of-bounds lanes.
        g_tile = pl.program_id(0) * tiles_per_chunk + t_idx
        lane = jax.lax.broadcasted_iota(jnp.int32, (1, TP), 1)
        inb_row = (g_tile * TP + lane) < total_pixels   # (1, TP)
        x = jnp.where(inb_row, x, 0.0)                  # keep garbage out of exp/dot
        tgt_row = jnp.where(inb_row, tgt_row, ignore_index)
        sub = jax.lax.broadcasted_iota(jnp.int32, (TP, 1), 0)
        inb_col = (g_tile * TP + sub) < total_pixels    # (TP, 1)
        tgt_c = jnp.where(inb_col, tgt_c, Cp)           # sentinel >= Cp: no column

    # ---- pixel-wise CE over the Q channels (loss_masks, CE term) ---------------
    valid_f = (tgt_row != ignore_index).astype(jnp.float32)     # (1, TP)
    m = jnp.max(x, axis=0, keepdims=True)                       # (1, TP), reused below
    ex = jnp.exp(x - m)                                         # single (Q,TP) EUP pass
    lse = m + jnp.log(jnp.sum(ex, axis=0, keepdims=True))       # (1, TP)
    qiota = jax.lax.broadcasted_iota(jnp.int32, (Q, 1), 0)      # (Q, 1)
    # gather the target channel first, then form the loss (no full log-softmax).
    x_t = jnp.sum(jnp.where(qiota == tgt_row, x, 0.0), axis=0, keepdims=True)
    ce_ref[...] += jnp.sum((lse - x_t) * valid_f, axis=1, keepdims=True)
    cnt_ref[...] += jnp.sum(valid_f, axis=1, keepdims=True)

    # ---- per-pixel query assignment + per-class MXU reductions -----------------
    # argmax over queries of sigmoid == argmax of the logits (monotone); reuse m.
    assigned = jnp.min(jnp.where(x == m, qiota, Q), axis=0, keepdims=True)  # (1,TP)
    assign_oh = (qiota == assigned).astype(jnp.bfloat16)        # (Q, TP), exact bf16
    sig = (0.5 * jnp.tanh(0.5 * x) + 0.5).astype(jnp.bfloat16)  # sigmoid via EUP tanh

    ciota = jax.lax.broadcasted_iota(jnp.int32, (1, Cp), 1)     # (1, Cp)
    rhs = (ciota == tgt_c).astype(jnp.bfloat16)                 # (TP, Cp) MXU-natural

    # (Q, TP) x (TP, Cp) -> (Q, Cp) contractions on the MXU (no operand transpose).
    hist_ref[...] += jnp.dot(assign_oh, rhs, preferred_element_type=jnp.float32)
    inter_ref[...] += jnp.dot(sig, rhs, preferred_element_type=jnp.float32)


# -----------------------------------------------------------------------------
# Wrapper
# -----------------------------------------------------------------------------
def mask2former_loss(pred_logits, pred_masks, targets, *, num_classes,
                     matcher_weight_dict=None, eos_coef=0.1, ignore_index=255,
                     tile_p=4096):
    """Forward pass of Mask2FormerLoss (losses=['labels', 'masks'])."""
    if matcher_weight_dict is None:
        matcher_weight_dict = {'class': 2, 'mask': 5, 'dice': 5}

    B, Q, H, W = pred_masks.shape
    P = H * W
    C = num_classes
    Cp = _round_up(C + 1, 128)     # class columns + the "all pixels" column at C

    # Free reshapes only — no transpose / pad / astype of the big tensor in HBM.
    # Targets are tiny; pass them in both (row & column) orientations so neither
    # the CE path nor the MXU one-hot needs an in-kernel relayout.
    masks = pred_masks.reshape(B, Q, P)
    tgt_row = targets.reshape(B, 1, P).astype(jnp.int32)
    tgt_col = targets.reshape(B, P, 1).astype(jnp.int32)

    tile, mask_tail = _pick_tile(P, tile_p)
    num_tiles = -(-P // tile)
    # Split the pixel range into two parallel chunks when B is odd so both v7x
    # TensorCores stay busy (no effect on single-TC v5e/v6e).
    n_chunk = 2 if (B % 2 == 1 and num_tiles % 2 == 0) else 1
    tpc = num_tiles // n_chunk

    kernel = functools.partial(
        _pixel_stats_kernel, num_classes=C, ignore_index=ignore_index,
        total_pixels=P, tiles_per_chunk=tpc, mask_tail=mask_tail)

    cost = pl.CostEstimate(
        flops=int(4 * B * Q * P * Cp + 16 * B * Q * P),
        transcendentals=int(2 * B * Q * P + B * P),
        bytes_accessed=int(masks.size * masks.dtype.itemsize + 8 * B * P
                           + 8 * n_chunk * B * Q * Cp))

    hist_f, inter_f, ce_part, cnt_part = pl.pallas_call(
        kernel,
        out_shape=(
            jax.ShapeDtypeStruct((n_chunk * B, Q, Cp), jnp.float32),  # assignment hist
            jax.ShapeDtypeStruct((n_chunk * B, Q, Cp), jnp.float32),  # dice inter (+ssum)
            jax.ShapeDtypeStruct((n_chunk * B, 1, 1), jnp.float32),   # pixel-CE partial
            jax.ShapeDtypeStruct((n_chunk * B, 1, 1), jnp.float32),   # valid pixel count
        ),
        grid=(n_chunk, B, tpc),
        in_specs=[
            pl.BlockSpec((None, Q, tile), lambda c, b, t: (b, 0, c * tpc + t)),
            pl.BlockSpec((None, 1, tile), lambda c, b, t: (b, 0, c * tpc + t)),
            pl.BlockSpec((None, tile, 1), lambda c, b, t: (b, c * tpc + t, 0)),
        ],
        out_specs=(
            pl.BlockSpec((None, Q, Cp), lambda c, b, t: (c * B + b, 0, 0)),
            pl.BlockSpec((None, Q, Cp), lambda c, b, t: (c * B + b, 0, 0)),
            pl.BlockSpec((None, 1, 1), lambda c, b, t: (c * B + b, 0, 0)),
            pl.BlockSpec((None, 1, 1), lambda c, b, t: (c * B + b, 0, 0)),
        ),
        compiler_params=pltpu.CompilerParams(
            dimension_semantics=("parallel", "parallel", "arbitrary"),
            vmem_limit_bytes=48 * 1024 * 1024),
        cost_estimate=cost,
    )(masks, tgt_row, tgt_col)

    hist_full = hist_f.reshape(n_chunk, B, Q, Cp).sum(axis=0)      # (B, Q, Cp)
    inter_full = inter_f.reshape(n_chunk, B, Q, Cp).sum(axis=0)    # (B, Q, Cp)
    ce_sum = jnp.sum(ce_part)
    cnt_sum = jnp.sum(cnt_part)

    hist = hist_full[..., :C]                                      # (B, Q, C)
    inter = inter_full[..., :C]                                    # (B, Q, C)
    # Column C of the one-hot was 1 for every (in-bounds) pixel, so the padded
    # row-sum of inter is exactly sum_p sigmoid(pred_masks)  (src_sum).
    src_sum = jnp.sum(inter_full, axis=-1, keepdims=True)          # (B, Q, 1)

    # ---- loss_masks: CE term (mean over non-ignored pixels) --------------------
    ce_masks = ce_sum / cnt_sum

    # ---- loss_masks: dice term --------------------------------------------------
    tgt_cnt = jnp.sum(hist, axis=1)                                    # (B, C)
    dice_score = 2.0 * inter / (src_sum + tgt_cnt[:, None, :] + 1e-8)  # (B, Q, C)
    present = jnp.sum(tgt_cnt, axis=0) > 0                             # class appears
    dice_loss = jnp.sum(
        jnp.where(present, 1.0 - jnp.mean(dice_score, axis=(0, 1)), 0.0)) / C

    # ---- loss_labels (tiny O(B*Q*C): plain JAX; launch overhead > compute) -----
    # Per-query target class = mode of the valid-pixel labels assigned to it.
    # TODO(synk): exact ties in the mode / argmax resolve to the smallest class /
    #             query index; torch's tie-break on exact float/count ties is unspecified.
    has_pix = jnp.sum(hist, axis=-1) > 0
    target_classes = jnp.where(has_pix, jnp.argmax(hist, axis=-1), C).astype(jnp.int32)
    logp = jax.nn.log_softmax(pred_logits.astype(jnp.float32), axis=-1)
    empty_weight = jnp.ones((C + 1,), jnp.float32).at[C].set(eos_coef)
    picked = jnp.take_along_axis(logp, target_classes[..., None], axis=-1)[..., 0]
    ce_cls = jnp.where(target_classes != C,
                       -picked * empty_weight[target_classes], 0.0)
    loss_cls = jnp.mean((1.0 - jnp.exp(-ce_cls)) ** 2 * ce_cls)

    loss_mask = (matcher_weight_dict['mask'] * ce_masks
                 + matcher_weight_dict['dice'] * dice_loss)
    return matcher_weight_dict['class'] * loss_cls + loss_mask


# -----------------------------------------------------------------------------
# Pure-JAX reference (mirrors the PyTorch module, vectorized)
# -----------------------------------------------------------------------------
def _mask2former_loss_ref(pred_logits, pred_masks, targets, *, num_classes,
                          matcher_weight_dict, eos_coef, ignore_index):
    B, Q, _ = pred_logits.shape
    _, _, H, W = pred_masks.shape
    P = H * W
    C = num_classes

    x = pred_masks.astype(jnp.float32).reshape(B, Q, P)
    sig = jax.nn.sigmoid(x)
    tgt = targets.reshape(B, P)
    valid = tgt != ignore_index

    # --- loss_labels ---
    assign = jnp.argmax(sig, axis=1)                                     # (B, P)
    assign_oh = (assign[:, None, :] == jnp.arange(Q)[None, :, None])     # (B, Q, P)
    tgt_oh = (tgt[:, None, :] == jnp.arange(C)[None, :, None])           # (B, C, P)
    hist = jnp.einsum('bqp,bcp->bqc',
                      (assign_oh & valid[:, None, :]).astype(jnp.float32),
                      tgt_oh.astype(jnp.float32))
    has_pix = hist.sum(-1) > 0
    target_classes = jnp.where(has_pix, jnp.argmax(hist, axis=-1), C)

    logp = jax.nn.log_softmax(pred_logits.astype(jnp.float32), axis=-1)
    empty_weight = jnp.ones((C + 1,), jnp.float32).at[-1].set(eos_coef)
    picked = jnp.take_along_axis(logp, target_classes[..., None], axis=-1)[..., 0]
    ce = jnp.where(target_classes != C, -picked * empty_weight[target_classes], 0.0)
    loss_cls = jnp.mean((1.0 - jnp.exp(-ce)) ** 2 * ce)

    # --- loss_masks: pixel CE over the Q channels ---
    lse = jax.scipy.special.logsumexp(x, axis=1)                         # (B, P)
    x_t = jnp.take_along_axis(x, jnp.where(valid, tgt, 0)[:, None, :], axis=1)[:, 0, :]
    ce_px = jnp.where(valid, lse - x_t, 0.0)
    ce_masks = ce_px.sum() / valid.sum()

    # --- dice ---
    inter = jnp.einsum('bqp,bcp->bqc', sig, tgt_oh.astype(jnp.float32))
    src_sum = sig.sum(axis=-1)[..., None]                                # (B, Q, 1)
    tgt_cnt = tgt_oh.astype(jnp.float32).sum(axis=-1)                    # (B, C)
    dice_score = 2.0 * inter / (src_sum + tgt_cnt[:, None, :] + 1e-8)
    present = tgt_cnt.sum(axis=0) > 0
    dice_loss = jnp.sum(
        jnp.where(present, 1.0 - dice_score.mean(axis=(0, 1)), 0.0)) / C

    loss_mask = (matcher_weight_dict['mask'] * ce_masks
                 + matcher_weight_dict['dice'] * dice_loss)
    return matcher_weight_dict['class'] * loss_cls + loss_mask


if __name__ == "__main__":
    key = jax.random.PRNGKey(0)
    k1, k2, k3, k4 = jax.random.split(key, 4)

    B, num_classes, num_queries, H, W = 2, 4, 8, 16, 16
    ignore_index = 255
    weight_dict = {'class': 2, 'mask': 5, 'dice': 5}
    eos_coef = 0.1

    pred_logits = jax.random.normal(k1, (B, num_queries, num_classes + 1),
                                    dtype=jnp.float32)
    pred_masks = jax.random.normal(k2, (B, num_queries, H, W), dtype=jnp.float32)
    targets = jax.random.randint(k3, (B, H, W), 0, num_classes, dtype=jnp.int32)
    ignore_mask = jax.random.uniform(k4, (B, H, W)) < 0.1
    targets = jnp.where(ignore_mask, ignore_index, targets)

    loss = mask2former_loss(pred_logits, pred_masks, targets,
                            num_classes=num_classes,
                            matcher_weight_dict=weight_dict,
                            eos_coef=eos_coef,
                            ignore_index=ignore_index)
    loss = jax.block_until_ready(loss)

    ref = _mask2former_loss_ref(pred_logits, pred_masks, targets,
                                num_classes=num_classes,
                                matcher_weight_dict=weight_dict,
                                eos_coef=eos_coef,
                                ignore_index=ignore_index)
    ref = jax.block_until_ready(ref)

    # Tolerance accounts for bf16 MXU operands in the dice-intersection / mask-sum
    # contraction and minor transcendental implementation deltas.
    assert bool(jnp.isfinite(loss)), loss
    assert jnp.allclose(loss, ref, rtol=1e-3, atol=1e-3), (loss, ref)

    print("KERNEL_OK")
</pallas_src>

<mosaic_0001>
module attributes {stable_mosaic.version = 11 : i64} {
  func.func @_pixel_stats_kernel(%arg0: i32, %arg1: i32, %arg2: i32, %arg3: memref<1x8x256xf32, #tpu.memory_space<vmem>>, %arg4: memref<1x1x256xi32, #tpu.memory_space<vmem>>, %arg5: memref<1x256x1xi32, #tpu.memory_space<vmem>>, %arg6: memref<1x8x128xf32, #tpu.memory_space<vmem>>, %arg7: memref<1x8x128xf32, #tpu.memory_space<vmem>>, %arg8: memref<1x1x1xf32, #tpu.memory_space<vmem>>, %arg9: memref<1x1x1xf32, #tpu.memory_space<vmem>>) attributes {dimension_semantics = [#tpu.dimension_semantics<parallel>, #tpu.dimension_semantics<parallel>, #tpu.dimension_semantics<arbitrary>], iteration_bounds = array<i64: 1, 2, 1>, scalar_prefetch = 0 : i64, scratch_operands = 0 : i64, tpu.core_type = #tpu.core_type<tc>, window_params = [{transform_indices = @transform_0, window_bounds = array<i64: 1, 8, 256>}, {transform_indices = @transform_1, window_bounds = array<i64: 1, 1, 256>}, {transform_indices = @transform_2, window_bounds = array<i64: 1, 256, 1>}, {transform_indices = @transform_3, window_bounds = array<i64: 1, 8, 128>}, {transform_indices = @transform_4, window_bounds = array<i64: 1, 8, 128>}, {transform_indices = @transform_5, window_bounds = array<i64: 1, 1, 1>}, {transform_indices = @transform_6, window_bounds = array<i64: 1, 1, 1>}]} {
    %c0_i32 = arith.constant 0 : i32
    %0 = arith.cmpi eq, %arg2, %c0_i32 : i32
    %1 = arith.extui %0 : i1 to i32
    %c0_i32_0 = arith.constant 0 : i32
    %2 = arith.cmpi ne, %1, %c0_i32_0 : i32
    scf.if %2 {
      %cst_47 = arith.constant 0.000000e+00 : f32
      %101 = vector.broadcast %cst_47 : f32 to vector<8x128xf32>
      %c0_48 = arith.constant 0 : index
      %c0_49 = arith.constant 0 : index
      %c0_50 = arith.constant 0 : index
      %102 = vector.load %arg6[%c0_48, %c0_49, %c0_50] : memref<1x8x128xf32, #tpu.memory_space<vmem>>, vector<1x8x128xf32>
      %103 = vector.shape_cast %102 : vector<1x8x128xf32> to vector<8x128xf32>
      %104 = vector.shape_cast %101 : vector<8x128xf32> to vector<1x8x128xf32>
      tpu.vector_store %arg6[%c0_48, %c0_49, %c0_50], %104 {strides = array<i32>} : memref<1x8x128xf32, #tpu.memory_space<vmem>>, vector<1x8x128xf32>,
      %cst_51 = arith.constant 0.000000e+00 : f32
      %105 = vector.broadcast %cst_51 : f32 to vector<8x128xf32>
      %c0_52 = arith.constant 0 : index
      %c0_53 = arith.constant 0 : index
      %c0_54 = arith.constant 0 : index
      %106 = vector.load %arg7[%c0_52, %c0_53, %c0_54] : memref<1x8x128xf32, #tpu.memory_space<vmem>>, vector<1x8x128xf32>
      %107 = vector.shape_cast %106 : vector<1x8x128xf32> to vector<8x128xf32>
      %108 = vector.shape_cast %105 : vector<8x128xf32> to vector<1x8x128xf32>
      tpu.vector_store %arg7[%c0_52, %c0_53, %c0_54], %108 {strides = array<i32>} : memref<1x8x128xf32, #tpu.memory_space<vmem>>, vector<1x8x128xf32>,
      %cst_55 = arith.constant 0.000000e+00 : f32
      %109 = vector.broadcast %cst_55 : f32 to vector<1x1xf32>
      %c0_56 = arith.constant 0 : index
      %c0_57 = arith.constant 0 : index
      %c0_58 = arith.constant 0 : index
      %110 = vector.load %arg8[%c0_56, %c0_57, %c0_58] : memref<1x1x1xf32, #tpu.memory_space<vmem>>, vector<1x1x1xf32>
      %111 = vector.shape_cast %110 : vector<1x1x1xf32> to vector<1x1xf32>
      %112 = vector.shape_cast %109 : vector<1x1xf32> to vector<1x1x1xf32>
      tpu.vector_store %arg8[%c0_56, %c0_57, %c0_58], %112 {strides = array<i32>} : memref<1x1x1xf32, #tpu.memory_space<vmem>>, vector<1x1x1xf32>,
      %cst_59 = arith.constant 0.000000e+00 : f32
      %113 = vector.broadcast %cst_59 : f32 to vector<1x1xf32>
      %c0_60 = arith.constant 0 : index
      %c0_61 = arith.constant 0 : index
      %c0_62 = arith.constant 0 : index
      %114 = vector.load %arg9[%c0_60, %c0_61, %c0_62] : memref<1x1x1xf32, #tpu.memory_space<vmem>>, vector<1x1x1xf32>
      %115 = vector.shape_cast %114 : vector<1x1x1xf32> to vector<1x1xf32>
      %116 = vector.shape_cast %113 : vector<1x1xf32> to vector<1x1x1xf32>
      tpu.vector_store %arg9[%c0_60, %c0_61, %c0_62], %116 {strides = array<i32>} : memref<1x1x1xf32, #tpu.memory_space<vmem>>, vector<1x1x1xf32>,
    } else {
    }
    %c0 = arith.constant 0 : index
    %c0_1 = arith.constant 0 : index
    %c0_2 = arith.constant 0 : index
    %3 = vector.load %arg3[%c0, %c0_1, %c0_2] : memref<1x8x256xf32, #tpu.memory_space<vmem>>, vector<1x8x256xf32>
    %4 = vector.shape_cast %3 : vector<1x8x256xf32> to vector<8x256xf32>
    %c0_3 = arith.constant 0 : index
    %c0_4 = arith.constant 0 : index
    %c0_5 = arith.constant 0 : index
    %5 = vector.load %arg4[%c0_3, %c0_4, %c0_5] : memref<1x1x256xi32, #tpu.memory_space<vmem>>, vector<1x1x256xi32>
    %6 = vector.shape_cast %5 : vector<1x1x256xi32> to vector<1x256xi32>
    %c0_6 = arith.constant 0 : index
    %c0_7 = arith.constant 0 : index
    %c0_8 = arith.constant 0 : index
    %7 = vector.load %arg5[%c0_6, %c0_7, %c0_8] : memref<1x256x1xi32, #tpu.memory_space<vmem>>, vector<1x256x1xi32>
    %8 = vector.shape_cast %7 : vector<1x256x1xi32> to vector<256x1xi32>
    %c255_i32 = arith.constant 255 : i32
    %9 = vector.broadcast %c255_i32 : i32 to vector<256x1xi32>
    %10 = arith.cmpi ne, %8, %9 : vector<256x1xi32>
    %c0_i32_9 = arith.constant 0 : i32
    %11 = vector.broadcast %c0_i32_9 : i32 to vector<256x1xi32>
    %12 = arith.cmpi sge, %8, %11 : vector<256x1xi32>
    %13 = arith.andi %10, %12 : vector<256x1xi1>
    %c4_i32 = arith.constant 4 : i32
    %14 = vector.broadcast %c4_i32 : i32 to vector<256x1xi32>
    %15 = arith.cmpi slt, %8, %14 : vector<256x1xi32>
    %16 = arith.andi %13, %15 : vector<256x1xi1>
    %c4_i32_10 = arith.constant 4 : i32
    %17 = vector.broadcast %c4_i32_10 : i32 to vector<256x1xi32>
    %18 = arith.select %16, %8, %17 : vector<256x1xi1>, vector<256x1xi32>
    %c255_i32_11 = arith.constant 255 : i32
    %19 = vector.broadcast %c255_i32_11 : i32 to vector<1x256xi32>
    %20 = arith.cmpi ne, %6, %19 : vector<1x256xi32>
    %21 = arith.extui %20 : vector<1x256xi1> to vector<1x256xi32>
    %22 = arith.sitofp %21 : vector<1x256xi32> to vector<1x256xf32>
    %cst = arith.constant dense<0xFF800000> : vector<256xf32>
    %23 = vector.multi_reduction <maximumf>, %4, %cst [0] : vector<8x256xf32> to vector<256xf32>
    %24 = vector.shape_cast %23 : vector<256xf32> to vector<1x256xf32>
    %25 = vector.broadcast %24 : vector<1x256xf32> to vector<8x256xf32>
    %26 = arith.subf %4, %25 : vector<8x256xf32>
    %27 = math.exp %26 : vector<8x256xf32>
    %cst_12 = arith.constant dense<0.000000e+00> : vector<256xf32>
    %28 = vector.multi_reduction <add>, %27, %cst_12 [0] : vector<8x256xf32> to vector<256xf32>
    %29 = vector.shape_cast %28 : vector<256xf32> to vector<1x256xf32>
    %30 = math.log %29 : vector<1x256xf32>
    %31 = arith.addf %24, %30 : vector<1x256xf32>
    %32 = tpu.iota {dimensions = array<i32: 0>} : vector<8x1xi32>
    %33 = vector.broadcast %32 : vector<8x1xi32> to vector<8x256xi32>
    %34 = vector.broadcast %6 : vector<1x256xi32> to vector<8x256xi32>
    %35 = arith.cmpi eq, %33, %34 : vector<8x256xi32>
    %cst_13 = arith.constant 0.000000e+00 : f32
    %36 = vector.broadcast %cst_13 : f32 to vector<8x256xf32>
    %37 = arith.select %35, %4, %36 : vector<8x256xi1>, vector<8x256xf32>
    %cst_14 = arith.constant dense<0.000000e+00> : vector<256xf32>
    %38 = vector.multi_reduction <add>, %37, %cst_14 [0] : vector<8x256xf32> to vector<256xf32>
    %39 = vector.shape_cast %38 : vector<256xf32> to vector<1x256xf32>
    %c0_15 = arith.constant 0 : index
    %c0_16 = arith.constant 0 : index
    %c0_17 = arith.constant 0 : index
    %40 = vector.load %arg8[%c0_15, %c0_16, %c0_17] : memref<1x1x1xf32, #tpu.memory_space<vmem>>, vector<1x1x1xf32>
    %41 = vector.shape_cast %40 : vector<1x1x1xf32> to vector<1x1xf32>
    %42 = arith.subf %31, %39 : vector<1x256xf32>
    %43 = arith.mulf %42, %22 : vector<1x256xf32>
    %cst_18 = arith.constant dense<0.000000e+00> : vector<1xf32>
    %44 = vector.multi_reduction <add>, %43, %cst_18 [1] : vector<1x256xf32> to vector<1xf32>
    %45 = vector.shape_cast %44 : vector<1xf32> to vector<1x1xf32>
    %46 = arith.addf %41, %45 : vector<1x1xf32>
    %c0_19 = arith.constant 0 : index
    %c0_20 = arith.constant 0 : index
    %c0_21 = arith.constant 0 : index
    %47 = vector.load %arg8[%c0_19, %c0_20, %c0_21] : memref<1x1x1xf32, #tpu.memory_space<vmem>>, vector<1x1x1xf32>
    %48 = vector.shape_cast %47 : vector<1x1x1xf32> to vector<1x1xf32>
    %49 = vector.shape_cast %46 : vector<1x1xf32> to vector<1x1x1xf32>
    tpu.vector_store %arg8[%c0_19, %c0_20, %c0_21], %49 {strides = array<i32>} : memref<1x1x1xf32, #tpu.memory_space<vmem>>, vector<1x1x1xf32>,
    %c0_22 = arith.constant 0 : index
    %c0_23 = arith.constant 0 : index
    %c0_24 = arith.constant 0 : index
    %50 = vector.load %arg9[%c0_22, %c0_23, %c0_24] : memref<1x1x1xf32, #tpu.memory_space<vmem>>, vector<1x1x1xf32>
    %51 = vector.shape_cast %50 : vector<1x1x1xf32> to vector<1x1xf32>
    %cst_25 = arith.constant dense<0.000000e+00> : vector<1xf32>
    %52 = vector.multi_reduction <add>, %22, %cst_25 [1] : vector<1x256xf32> to vector<1xf32>
    %53 = vector.shape_cast %52 : vector<1xf32> to vector<1x1xf32>
    %54 = arith.addf %51, %53 : vector<1x1xf32>
    %c0_26 = arith.constant 0 : index
    %c0_27 = arith.constant 0 : index
    %c0_28 = arith.constant 0 : index
    %55 = vector.load %arg9[%c0_26, %c0_27, %c0_28] : memref<1x1x1xf32, #tpu.memory_space<vmem>>, vector<1x1x1xf32>
    %56 = vector.shape_cast %55 : vector<1x1x1xf32> to vector<1x1xf32>
    %57 = vector.shape_cast %54 : vector<1x1xf32> to vector<1x1x1xf32>
    tpu.vector_store %arg9[%c0_26, %c0_27, %c0_28], %57 {strides = array<i32>} : memref<1x1x1xf32, #tpu.memory_space<vmem>>, vector<1x1x1xf32>,
    %58 = vector.broadcast %24 : vector<1x256xf32> to vector<8x256xf32>
    %59 = arith.cmpf oeq, %4, %58 : vector<8x256xf32>
    %c8_i32 = arith.constant 8 : i32
    %60 = vector.shape_cast %32 : vector<8x1xi32> to vector<8x1xi32>
    %61 = vector.broadcast %60 : vector<8x1xi32> to vector<8x256xi32>
    %62 = vector.broadcast %c8_i32 : i32 to vector<8x256xi32>
    %63 = arith.select %59, %61, %62 : vector<8x256xi1>, vector<8x256xi32>
    %cst_29 = arith.constant dense<2147483647> : vector<256xi32>
    %64 = vector.multi_reduction <minsi>, %63, %cst_29 [0] : vector<8x256xi32> to vector<256xi32>
    %65 = vector.shape_cast %64 : vector<256xi32> to vector<1x256xi32>
    %66 = vector.broadcast %32 : vector<8x1xi32> to vector<8x256xi32>
    %67 = vector.broadcast %65 : vector<1x256xi32> to vector<8x256xi32>
    %68 = arith.cmpi eq, %66, %67 : vector<8x256xi32>
    %69 = arith.extui %68 : vector<8x256xi1> to vector<8x256xi32>
    %70 = arith.sitofp %69 : vector<8x256xi32> to vector<8x256xf32>
    %71 = arith.truncf %70 : vector<8x256xf32> to vector<8x256xbf16>
    %cst_30 = arith.constant 5.000000e-01 : f32
    %72 = vector.broadcast %cst_30 : f32 to vector<8x256xf32>
    %73 = arith.mulf %72, %4 : vector<8x256xf32>
    %74 = math.tanh %73 : vector<8x256xf32>
    %cst_31 = arith.constant 5.000000e-01 : f32
    %75 = vector.broadcast %cst_31 : f32 to vector<8x256xf32>
    %76 = arith.mulf %75, %74 : vector<8x256xf32>
    %cst_32 = arith.constant 5.000000e-01 : f32
    %77 = vector.broadcast %cst_32 : f32 to vector<8x256xf32>
    %78 = arith.addf %76, %77 : vector<8x256xf32>
    %79 = arith.truncf %78 : vector<8x256xf32> to vector<8x256xbf16>
    %80 = tpu.iota {dimensions = array<i32: 1>} : vector<1x128xi32>
    %81 = vector.broadcast %80 : vector<1x128xi32> to vector<256x128xi32>
    %82 = vector.broadcast %18 : vector<256x1xi32> to vector<256x128xi32>
    %83 = arith.cmpi eq, %81, %82 : vector<256x128xi32>
    %84 = arith.extui %83 : vector<256x128xi1> to vector<256x128xi32>
    %85 = arith.sitofp %84 : vector<256x128xi32> to vector<256x128xf32>
    %86 = arith.truncf %85 : vector<256x128xf32> to vector<256x128xbf16>
    %c0_33 = arith.constant 0 : index
    %c0_34 = arith.constant 0 : index
    %c0_35 = arith.constant 0 : index
    %87 = vector.load %arg6[%c0_33, %c0_34, %c0_35] : memref<1x8x128xf32, #tpu.memory_space<vmem>>, vector<1x8x128xf32>
    %88 = vector.shape_cast %87 : vector<1x8x128xf32> to vector<8x128xf32>
    %cst_36 = arith.constant dense<0.000000e+00> : vector<8x128xf32>
    %89 = tpu.matmul %71, %86, %cst_36 {dimension_numbers = #tpu.dot_dimension_numbers<[1], [0], [0], [1], [0, 0, 1, 1], [], []>} : vector<8x256xbf16>, vector<256x128xbf16>, vector<8x128xf32> -> vector<8x128xf32>
    %90 = arith.addf %88, %89 : vector<8x128xf32>
    %c0_37 = arith.constant 0 : index
    %c0_38 = arith.constant 0 : index
    %c0_39 = arith.constant 0 : index
    %91 = vector.load %arg6[%c0_37, %c0_38, %c0_39] : memref<1x8x128xf32, #tpu.memory_space<vmem>>, vector<1x8x128xf32>
    %92 = vector.shape_cast %91 : vector<1x8x128xf32> to vector<8x128xf32>
    %93 = vector.shape_cast %90 : vector<8x128xf32> to vector<1x8x128xf32>
    tpu.vector_store %arg6[%c0_37, %c0_38, %c0_39], %93 {strides = array<i32>} : memref<1x8x128xf32, #tpu.memory_space<vmem>>, vector<1x8x128xf32>,
    %c0_40 = arith.constant 0 : index
    %c0_41 = arith.constant 0 : index
    %c0_42 = arith.constant 0 : index
    %94 = vector.load %arg7[%c0_40, %c0_41, %c0_42] : memref<1x8x128xf32, #tpu.memory_space<vmem>>, vector<1x8x128xf32>
    %95 = vector.shape_cast %94 : vector<1x8x128xf32> to vector<8x128xf32>
    %cst_43 = arith.constant dense<0.000000e+00> : vector<8x128xf32>
    %96 = tpu.matmul %79, %86, %cst_43 {dimension_numbers = #tpu.dot_dimension_numbers<[1], [0], [0], [1], [0, 0, 1, 1], [], []>} : vector<8x256xbf16>, vector<256x128xbf16>, vector<8x128xf32> -> vector<8x128xf32>
    %97 = arith.addf %95, %96 : vector<8x128xf32>
    %c0_44 = arith.constant 0 : index
    %c0_45 = arith.constant 0 : index
    %c0_46 = arith.constant 0 : index
    %98 = vector.load %arg7[%c0_44, %c0_45, %c0_46] : memref<1x8x128xf32, #tpu.memory_space<vmem>>, vector<1x8x128xf32>
    %99 = vector.shape_cast %98 : vector<1x8x128xf32> to vector<8x128xf32>
    %100 = vector.shape_cast %97 : vector<8x128xf32> to vector<1x8x128xf32>
    tpu.vector_store %arg7[%c0_44, %c0_45, %c0_46], %100 {strides = array<i32>} : memref<1x8x128xf32, #tpu.memory_space<vmem>>, vector<1x8x128xf32>,
    return
  }
  func.func @transform_0(%arg0: i32, %arg1: i32, %arg2: i32) -> (i32, i32, i32) {
    %c1_i32 = arith.constant 1 : i32
    %0 = arith.muli %arg0, %c1_i32 : i32
    %1 = arith.addi %0, %arg2 : i32
    %c0_i32 = arith.constant 0 : i32
    %c0_i32_0 = arith.constant 0 : i32
    return %arg1, %c0_i32, %1 : i32, i32, i32
  }
  func.func @transform_1(%arg0: i32, %arg1: i32, %arg2: i32) -> (i32, i32, i32) {
    %c1_i32 = arith.constant 1 : i32
    %0 = arith.muli %arg0, %c1_i32 : i32
    %1 = arith.addi %0, %arg2 : i32
    %c0_i32 = arith.constant 0 : i32
    %c0_i32_0 = arith.constant 0 : i32
    return %arg1, %c0_i32, %1 : i32, i32, i32
  }
  func.func @transform_2(%arg0: i32, %arg1: i32, %arg2: i32) -> (i32, i32, i32) {
    %c1_i32 = arith.constant 1 : i32
    %0 = arith.muli %arg0, %c1_i32 : i32
    %1 = arith.addi %0, %arg2 : i32
    %c0_i32 = arith.constant 0 : i32
    %c0_i32_0 = arith.constant 0 : i32
    return %arg1, %1, %c0_i32 : i32, i32, i32
  }
  func.func @transform_3(%arg0: i32, %arg1: i32, %arg2: i32) -> (i32, i32, i32) {
    %c2_i32 = arith.constant 2 : i32
    %0 = arith.muli %arg0, %c2_i32 : i32
    %1 = arith.addi %0, %arg1 : i32
    %c0_i32 = arith.constant 0 : i32
    %c0_i32_0 = arith.constant 0 : i32
    %c0_i32_1 = arith.constant 0 : i32
    return %1, %c0_i32, %c0_i32_0 : i32, i32, i32
  }
  func.func @transform_4(%arg0: i32, %arg1: i32, %arg2: i32) -> (i32, i32, i32) {
    %c2_i32 = arith.constant 2 : i32
    %0 = arith.muli %arg0, %c2_i32 : i32
    %1 = arith.addi %0, %arg1 : i32
    %c0_i32 = arith.constant 0 : i32
    %c0_i32_0 = arith.constant 0 : i32
    %c0_i32_1 = arith.constant 0 : i32
    return %1, %c0_i32, %c0_i32_0 : i32, i32, i32
  }
  func.func @transform_5(%arg0: i32, %arg1: i32, %arg2: i32) -> (i32, i32, i32) {
    %c2_i32 = arith.constant 2 : i32
    %0 = arith.muli %arg0, %c2_i32 : i32
    %1 = arith.addi %0, %arg1 : i32
    %c0_i32 = arith.constant 0 : i32
    %c0_i32_0 = arith.constant 0 : i32
    %c0_i32_1 = arith.constant 0 : i32
    return %1, %c0_i32, %c0_i32_0 : i32, i32, i32
  }
  func.func @transform_6(%arg0: i32, %arg1: i32, %arg2: i32) -> (i32, i32, i32) {
    %c2_i32 = arith.constant 2 : i32
    %0 = arith.muli %arg0, %c2_i32 : i32
    %1 = arith.addi %0, %arg1 : i32
    %c0_i32 = arith.constant 0 : i32
    %c0_i32_0 = arith.constant 0 : i32
    %c0_i32_1 = arith.constant 0 : i32
    return %1, %c0_i32, %c0_i32_0 : i32, i32, i32
  }
}

</mosaic_0001>

<bundles_post_ra>
// kernel: tpu_custom_call.1
= control target key start
LH: loop header
LB: loop body
LE: loop exit
PB: predicated region body
PF: predicated region fallthrough
CT: control target
= control target key end

     0   :  { %12 = vsyncpa [#allocation3], 0  ;;  %s2126_s0 = inlined_call_operand.vmem [shape: f32[2,8,256], index: 0, kind: input, shape index: {}]   ;;  %s2127_s1 = inlined_call_operand.vmem [shape: s32[2,1,256], index: 1, kind: input, shape index: {}]   ;;  %s2128_s2 = inlined_call_operand.vmem [shape: s32[2,256,1], index: 2, kind: input, shape index: {}]   ;;  %s2129_s3 = inlined_call_operand.hbm [shape: f32[2,8,128], index: 3, kind: output, shape index: {0}]   ;;  %s2130_s4 = inlined_call_operand.hbm [shape: f32[2,8,128], index: 4, kind: output, shape index: {1}]   ;;  %s2131_s5 = inlined_call_operand.vmem [shape: f32[2,1,1], index: 5, kind: output, shape index: {2}]   ;;  %s2132_s6 = inlined_call_operand.vmem [shape: f32[2,1,1], index: 6, kind: output, shape index: {3}]  }
   0x1   :  { %14 = vsyncpa [#allocation3 + $0x1], 0 }
   0x2   :  { %15 = vsyncpa [#allocation5], 0 }
   0x3   :  { %17 = vsyncpa [#allocation5 + $0x1], 0  ;;  %s1740_s21 = smov 0   ;;  %s1742_s22 = smov 0  }
   0x4   :  { %s1744_s23 = smov 0   ;;  %s1746_s24 = smov 0  }
   0x5   :  { %s1748_s25 = smov 0   ;;  %s1750_s26 = smov 0  }
   0x6 LB: > { %s1348_s27 = sadd.s32 4294967295, %s1698_s26   ;;  %s1349_s28 = sadd.s32 4294967294, %s1698_s26   ;;  %s1698_s26 = sphi %s1750_s26, %s23_s26   ;;  %s1694_s25 = sphi %s1748_s25, %s2153_s25   ;;  %s1690_s24 = sphi %s1746_s24, %s2152_s24   ;;  %s1686_s23 = sphi %s1744_s23, %s2151_s23   ;;  %s1682_s22 = sphi %s1742_s22, %s2150_s22   ;;  %s1678_s21 = sphi %s1740_s21, %s2149_s21  }
   0x7   : > { %s38_s29 = sadd.s32 1, %s1694_s25  ;;  %s143_s30 = sadd.s32 1, %s1686_s23 }
   0x8   : > { %p40_p0 = scmp.ge.s32.totalorder %s38_s29, 2  ;;  %p153_p1 = scmp.ne.s32.totalorder %s1686_s23, %s1682_s22 }
   0x9   : > { %p154_p2 = scmp.eq.s32.totalorder %s1348_s27, 1  ;;  %p159_p3 = scmp.ne.s32.totalorder %s1682_s22, %s1678_s21 }
   0xa   : > { %s2155_s29 = smov (%p40_p0, %s38_s29), 0  ;;  %p160_p5 = scmp.eq.s32.totalorder %s1349_s28, 1 }
   0xb   : > { %p1780_p4 = por %p154_p2, %p153_p1  ;;  %s140_s8 = ssub.s32 %s1694_s25, %s2155_s29 }
   0xc   : > { %p1352_p6 = scmp.ge.s32.totalorder %s1698_s26, 1  ;;  %p141_p7 = scmp.eq.s32.totalorder %s140_s8, 0 }
   0xd   : > { %p1787_p8 = por %p160_p5, %p159_p3  ;;  %p312_p9 = scmp.lt.s32.totalorder %s1698_s26, 3 }
   0xe   : > { %s1793_s10 = scalar_select %p141_p7, %s1686_s23, %s143_s30  }
   0xf   : > { %p313_p10 = pnand %p1352_p6, %p312_p9 }
  0x10   : > { %p383_p11 = scmp.lt.s32.totalorder (!%p313_p10), %s1690_s24, 1  ;;  %s2044_s17 = sand.u32 (!%p313_p10), 1, %s1682_s22  }
  0x11   : > { %316 = sbr.rel (%p313_p10) target bundleno = 455 (0x1c7), region = 32  ;;  %s1353_s18 = sshll.u32 (!%p313_p10), %s2044_s17, 3 }
  0x12   : > { %s366_s27 = scalar_lea.vmem (!%p313_p10), [#allocation4], %s1353_s18 }
  0x13   : > { %s1151_s28 = sshll.u32 (!%p313_p10), %s366_s27, 4  ;;  %s2060_s28 = int_to_ptr.vmem [resolvable:$true] %s1151_s28 }
  0x16   : > { %v1700_v0 = vmov 0   ;;  %s1797_s11 = scalar_select %p383_p11, %s1690_s24, 1 }
  0x17   : > { %1579 = vset.pattern.permute.xlu1 %v1700_v0  ;;  %1578 = vset.pattern.permute.xlu0 %v1700_v0 }
  0x18   : > { %s1470_s12 = sshll.u32 %s1797_s11, 8  ;;  %s1469_s16 = sshll.u32 %s1797_s11, 4 }
  0x19   : > { %s1803_s15 = scalar_lea.vmem %s2128_s2, %s1470_s12  ;;  %s390_s19 = scalar_lea.vmem %s2126_s0, %s1469_s16 }
  0x1a   : > { %v477_v1 = vld [vmem:[%s1803_s15 + $0xf0] sm:$0xff]  ;;  %v478_v3 = vld [vmem:[%s1803_s15 + $0xf8] sm:$0xff]  ;;  %v475_v6 = vld [vmem:[%s1803_s15 + $0xe0] sm:$0xff]  ;;  %s1357_s20 = sshll.u32 %s1797_s11, 1  ;;  %s431_s13 = scalar_lea.vmem %s2132_s6, %s1797_s11 }
  0x1b   : > { %v461_v2 = vld [vmem:[%s1803_s15 + $0x70] sm:$0xff]  ;;  %vm509_vm0 = vcmp.ne.s32.totalorder %v477_v1, 255  ;;  %vm541_vm1 = vcmp.ge.s32.totalorder %v477_v1, 0  ;;  %vm605_vm2 = vcmp.lt.s32.totalorder %v477_v1, 4  ;;  %v462_v4 = vld [vmem:[%s1803_s15 + $0x78] sm:$0xff]  ;;  %vm510_vm8 = vcmp.ne.s32.totalorder %v478_v3, 255  ;;  %s401_s30 = scalar_lea.vmem %s2127_s1, %s1357_s20  ;;  %s424_s16 = scalar_lea.vmem %s2131_s5, %s1797_s11 }
  0x1c   : > { %vm493_vm3 = vcmp.ne.s32.totalorder %v461_v2, 255  ;;  %vm573_vm4 = vmand %vm509_vm0, %vm541_vm1  ;;  %vm525_vm5 = vcmp.ge.s32.totalorder %v461_v2, 0  ;;  %vm589_vm6 = vcmp.lt.s32.totalorder %v461_v2, 4  ;;  %vm542_vm9 = vcmp.ge.s32.totalorder %v478_v3, 0  ;;  %v476_v8 = vld [vmem:[%s1803_s15 + $0xe8] sm:$0xff]  ;;  %v459_v12 = vld [vmem:[%s1803_s15 + $0x60] sm:$0xff] }
  0x1d   : > { %vm637_vm7 = vmand %vm573_vm4, %vm605_vm2  ;;  %vm606_vm11 = vcmp.lt.s32.totalorder %v478_v3, 4  ;;  %vm494_vm13 = vcmp.ne.s32.totalorder %v462_v4, 255  ;;  %vm526_vm14 = vcmp.ge.s32.totalorder %v462_v4, 0  ;;  %vm590_vm0 = vcmp.lt.s32.totalorder %v462_v4, 4  ;;  %v460_v10 = vld [vmem:[%s1803_s15 + $0x68] sm:$0xff]  ;;  %v474_v14 = vld [vmem:[%s1803_s15 + $0xd8] sm:$0xff] }
  0x1e   : > { %v669_v5 = vsel %vm637_vm7, %v477_v1, 4  ;;  %vm557_vm10 = vmand %vm493_vm3, %vm525_vm5  ;;  %vm507_vm2 = vcmp.ne.s32.totalorder %v475_v6, 255  ;;  %vm539_vm4 = vcmp.ge.s32.totalorder %v475_v6, 0  ;;  %vm603_vm3 = vcmp.lt.s32.totalorder %v475_v6, 4  ;;  %v473_v16 = vld [vmem:[%s1803_s15 + $0xd0] sm:$0xff]  ;;  %v458_v18 = vld [vmem:[%s1803_s15 + $0x58] sm:$0xff] }
  0x1f   : > { %902 = vperm.xlu0 %1578, %v669_v5   ;;  %vm621_vm12 = vmand %vm557_vm10, %vm589_vm6  ;;  %vm508_vm6 = vcmp.ne.s32.totalorder %v476_v8, 255  ;;  %vm540_vm10 = vcmp.ge.s32.totalorder %v476_v8, 0  ;;  %v457_v20 = vld [vmem:[%s1803_s15 + $0x50] sm:$0xff]  ;;  %v472_v22 = vld [vmem:[%s1803_s15 + $0xc8] sm:$0xff]  ;;  %s359_s11 = scalar_lea.vmem [#allocation2], %s1353_s18  ;;  %s1703_s18 = smov [#allocation2]  }
  0x20   : > { %v653_v7 = vsel %vm621_vm12, %v461_v2, 4  ;;  %vm574_vm15 = vmand %vm510_vm8, %vm542_vm9  ;;  %vm604_vm8 = vcmp.lt.s32.totalorder %v476_v8, 4  ;;  %v471_v24 = vld [vmem:[%s1803_s15 + $0xc0] sm:$0xff]  ;;  %v456_v26 = vld [vmem:[%s1803_s15 + $0x48] sm:$0xff]  ;;  %s1136_s20 = sshll.u32 %s359_s11, 4  ;;  %s2053_s20 = int_to_ptr.vmem [resolvable:$true] %s1136_s20 }
  0x21   : > { %854 = vperm.xlu1 %1579, %v653_v7   ;;  %vm638_vm1 = vmand %vm574_vm15, %vm606_vm11  ;;  %vm492_vm11 = vcmp.ne.s32.totalorder %v460_v10, 255  ;;  %vm524_vm15 = vcmp.ge.s32.totalorder %v460_v10, 0  ;;  %v455_v28 = vld [vmem:[%s1803_s15 + $0x40] sm:$0xff]  ;;  %v470_v30 = vld [vmem:[%s1803_s15 + $0xb8] sm:$0xff] }
  0x22   : > { %v670_v9 = vsel %vm638_vm1, %v478_v3, 4  ;;  %vm558_vm7 = vmand %vm494_vm13, %vm526_vm14  ;;  %vm588_vm13 = vcmp.lt.s32.totalorder %v460_v10, 4  ;;  %v469_v32 = vld [vmem:[%s1803_s15 + $0xb0] sm:$0xff]  ;;  %v454_v34 = vld [vmem:[%s1803_s15 + $0x38] sm:$0xff]  ;;  %v710_v3 = vlaneseq }
  0x23   : > { %905 = vperm.xlu0 %1578, %v670_v9   ;;  %vm622_vm5 = vmand %vm558_vm7, %vm590_vm0  ;;  %vm491_vm0 = vcmp.ne.s32.totalorder %v459_v12, 255  ;;  %vm523_vm7 = vcmp.ge.s32.totalorder %v459_v12, 0  ;;  %v453_v36 = vld [vmem:[%s1803_s15 + $0x30] sm:$0xff]  ;;  %v468_v39 = vld [vmem:[%s1803_s15 + $0xa8] sm:$0xff] }
  0x24   : > { %v654_v11 = vsel %vm622_vm5, %v462_v4, 4  ;;  %vm571_vm12 = vmand %vm507_vm2, %vm539_vm4  ;;  %vm587_vm2 = vcmp.lt.s32.totalorder %v459_v12, 4  ;;  %v467_v41 = vld [vmem:[%s1803_s15 + $0xa0] sm:$0xff]  ;;  %v1837_v42 = vld [vmem:[%s390_s19 + $0x8] sm:$0xff] }
  0x25   : > { %857 = vperm.xlu1 %1579, %v654_v11   ;;  %vm635_vm9 = vmand %vm571_vm12, %vm603_vm3  ;;  %vm506_vm3 = vcmp.ne.s32.totalorder %v474_v14, 255  ;;  %vm538_vm12 = vcmp.ge.s32.totalorder %v474_v14, 0  ;;  %v1843_v44 = vld [vmem:[%s390_s19] sm:$0xff]  ;;  %v680_v45 = vrot.slane %v1837_v42, 4  ;;  %v452_v47 = vld [vmem:[%s1803_s15 + $0x28] sm:$0xff]  ;;  %v800_v59 = vmul.f32 0.5, %v1837_v42 }
  0x26   : > { %v667_v13 = vsel %vm635_vm9, %v475_v6, 4  ;;  %vm572_vm1 = vmand %vm508_vm6, %vm540_vm10  ;;  %vm602_vm6 = vcmp.lt.s32.totalorder %v474_v14, 4  ;;  %v674_v48 = vrot.slane %v1843_v44, 4  ;;  %v451_v51 = vld [vmem:[%s1803_s15 + $0x20] sm:$0xff]  ;;  %v466_v56 = vld [vmem:[%s1803_s15 + $0x98] sm:$0xff]  ;;  %s1465_s19 = sshll.u32 %s1690_s24, 7 }
  0x27   : > { %896 = vperm.xlu0 %1578, %v667_v13   ;;  %vm636_vm14 = vmand %vm572_vm1, %vm604_vm8  ;;  %vm505_vm1 = vcmp.ne.s32.totalorder %v473_v16, 255  ;;  %vm537_vm8 = vcmp.ge.s32.totalorder %v473_v16, 0  ;;  %v681_v49 = vmax.f32 %v1837_v42, %v680_v45  ;;  %v465_v61 = vld [vmem:[%s1803_s15 + $0x90] sm:$0xff]  ;;  %1580 = vtanh.f32 %v800_v59  ;;  %v450_v2 = vld [vmem:[%s1803_s15 + $0x18] sm:$0xff]  ;;  %s2051_s12 = scalar_lea.hbm %s2129_s3, %s1465_s19  ;;  %s2058_s14 = scalar_lea.hbm %s2130_s4, %s1465_s19 }
  0x28   : > { %v668_v15 = vsel %vm636_vm14, %v476_v8, 4  ;;  %vm556_vm5 = vmand %vm492_vm11, %vm524_vm15  ;;  %vm601_vm11 = vcmp.lt.s32.totalorder %v473_v16, 4  ;;  %v675_v52 = vmax.f32 %v1843_v44, %v674_v48  ;;  %v449_v7 = vld [vmem:[%s1803_s15 + $0x10] sm:$0xff]  ;;  %v1882_v8 = vshrl.u32 %v710_v3, 7 }
  0x29   : > { %899 = vperm.xlu1 %1579, %v668_v15   ;;  %vm620_vm4 = vmand %vm556_vm5, %vm588_vm13  ;;  %vm490_vm5 = vcmp.ne.s32.totalorder %v458_v18, 255  ;;  %vm522_vm13 = vcmp.ge.s32.totalorder %v458_v18, 0  ;;  %v682_v54 = vrot.slane %v681_v49, 2 }
  0x2a   : > { %v652_v17 = vsel %vm620_vm4, %v460_v10, 4  ;;  %vm555_vm9 = vmand %vm491_vm0, %vm523_vm7  ;;  %vm586_vm0 = vcmp.lt.s32.totalorder %v458_v18, 4  ;;  %v676_v57 = vrot.slane %v675_v52, 2 }
  0x2b   : > { %vm619_vm10 = vmand %vm555_vm9, %vm587_vm2  ;;  %vm489_vm2 = vcmp.ne.s32.totalorder %v457_v20, 255  ;;  %vm521_vm9 = vcmp.ge.s32.totalorder %v457_v20, 0  ;;  %v683_v58 = vmax.f32 %v681_v49, %v682_v54  ;;  %v1701_v49 = vmov 1.0|1.0  }
  0x2c   : > { %v651_v19 = vsel %vm619_vm10, %v459_v12, 4  ;;  %vm570_vm14 = vmand %vm506_vm3, %vm538_vm12  ;;  %vm585_vm3 = vcmp.lt.s32.totalorder %v457_v20, 4  ;;  %v677_v62 = vmax.f32 %v675_v52, %v676_v57  ;;  %v464_v12 = vld [vmem:[%s1803_s15 + $0x88] sm:$0xff]  ;;  %v714_v52 = vsub.s32 0, %v1882_v8 }
  0x2d   : > { %851 = vperm.xlu1 %1579, %v652_v17   ;;  %848 = vperm.xlu0 %1578, %v651_v19   ;;  %vm634_vm15 = vmand %vm570_vm14, %vm602_vm6  ;;  %vm504_vm6 = vcmp.ne.s32.totalorder %v472_v22, 255  ;;  %vm536_vm14 = vcmp.ge.s32.totalorder %v472_v22, 0  ;;  %v684_v0 = vrot.slane %v683_v58, 1  ;;  %v463_v17 = vld [vmem:[%s1803_s15 + $0x80] sm:$0xff] }
  0x2e   : > { %v666_v21 = vsel %vm634_vm15, %v474_v14, 4  ;;  %vm569_vm4 = vmand %vm505_vm1, %vm537_vm8  ;;  %vm600_vm1 = vcmp.lt.s32.totalorder %v472_v22, 4  ;;  %v678_v4 = vrot.slane %v677_v62, 1 }
  0x2f   : > { %vm633_vm7 = vmand %vm569_vm4, %vm601_vm11  ;;  %vm503_vm4 = vcmp.ne.s32.totalorder %v471_v24, 255  ;;  %vm535_vm11 = vcmp.ge.s32.totalorder %v471_v24, 0  ;;  %v1877_v5 = vmax.f32 %v683_v58, %v684_v0 }
  0x30   : > { %v665_v23 = vsel %vm633_vm7, %v473_v16, 4  ;;  %vm554_vm10 = vmand %vm490_vm5, %vm522_vm13  ;;  %vm599_vm5 = vcmp.lt.s32.totalorder %v471_v24, 4  ;;  %v1884_v9 = vmax.f32 %v677_v62, %v678_v4 }
  0x31   : > { %893 = vperm.xlu1 %1579, %v666_v21   ;;  %890 = vperm.xlu0 %1578, %v665_v23   ;;  %vm618_vm12 = vmand %vm554_vm10, %vm586_vm0  ;;  %vm488_vm0 = vcmp.ne.s32.totalorder %v456_v26, 255  ;;  %vm520_vm10 = vcmp.ge.s32.totalorder %v456_v26, 0  ;;  %v448_v21 = vld [vmem:[%s1803_s15 + $0x8] sm:$0xff]  ;;  %v447_v23 = vld [vmem:[%s1803_s15] sm:$0xff]  ;;  %s1106_s15 = scalar_lea.sflag [#allocation3], %s2044_s17 }
  0x32   : > { %v650_v25 = vsel %vm618_vm12, %v458_v18, 4  ;;  %vm553_vm15 = vmand %vm489_vm2, %vm521_vm9  ;;  %vm584_vm2 = vcmp.lt.s32.totalorder %v456_v26, 4  ;;  %v686_v43 = vsub.f32 %v1843_v44, %v1884_v9 }
  0x33   : > { %vm617_vm8 = vmand %vm553_vm15, %vm585_vm3  ;;  %vm487_vm3 = vcmp.ne.s32.totalorder %v455_v28, 255  ;;  %vm519_vm15 = vcmp.ge.s32.totalorder %v455_v28, 0 }
  0x34   : > { %v649_v27 = vsel %vm617_vm8, %v457_v20, 4  ;;  %vm568_vm7 = vmand %vm504_vm6, %vm536_vm14  ;;  %vm583_vm6 = vcmp.lt.s32.totalorder %v455_v28, 4  ;;  %v688_v48 = vmul.f32 1.442695, %v686_v43 }
  0x35   : > { %845 = vperm.xlu1 %1579, %v650_v25   ;;  %842 = vperm.xlu0 %1578, %v649_v27   ;;  %vm632_vm13 = vmand %vm568_vm7, %vm600_vm1  ;;  %vm502_vm1 = vcmp.ne.s32.totalorder %v470_v30, 255  ;;  %vm534_vm7 = vcmp.ge.s32.totalorder %v470_v30, 0 }
  0x36   : > { %v664_v29 = vsel %vm632_vm13, %v472_v22, 4  ;;  %vm567_vm12 = vmand %vm503_vm4, %vm535_vm11  ;;  %vm598_vm4 = vcmp.lt.s32.totalorder %v470_v30, 4 }
  0x37   : > { %vm631_vm9 = vmand %vm567_vm12, %vm599_vm5  ;;  %vm501_vm5 = vcmp.ne.s32.totalorder %v469_v32, 255  ;;  %vm533_vm12 = vcmp.ge.s32.totalorder %v469_v32, 0 }
  0x38   : > { %v663_v31 = vsel %vm631_vm9, %v471_v24, 4  ;;  %vm552_vm8 = vmand %vm488_vm0, %vm520_vm10  ;;  %vm597_vm0 = vcmp.lt.s32.totalorder %v469_v32, 4 }
  0x39   : > { %887 = vperm.xlu1 %1579, %v664_v29   ;;  %884 = vperm.xlu0 %1578, %v663_v31   ;;  %vm616_vm14 = vmand %vm552_vm8, %vm584_vm2  ;;  %vm486_vm2 = vcmp.ne.s32.totalorder %v454_v34, 255  ;;  %vm582_vm8 = vcmp.lt.s32.totalorder %v454_v34, 4  ;;  %v1581_v29 = vpop.eup %1580 }
  0x3a   : > { %v648_v33 = vsel %vm616_vm14, %v456_v26, 4  ;;  %vm551_vm13 = vmand %vm487_vm3, %vm519_vm15  ;;  %vm518_vm3 = vcmp.ge.s32.totalorder %v454_v34, 0  ;;  %vm485_vm14 = vcmp.ne.s32.totalorder %v453_v36, 255 }
  0x3b   : > { %vm615_vm11 = vmand %vm551_vm13, %vm583_vm6  ;;  %vm581_vm13 = vcmp.lt.s32.totalorder %v453_v36, 4 }
  0x3c   : > { %v647_v35 = vsel %vm615_vm11, %v455_v28, 4  ;;  %vm566_vm9 = vmand %vm502_vm1, %vm534_vm7  ;;  %vm517_vm1 = vcmp.ge.s32.totalorder %v453_v36, 0  ;;  %vm500_vm11 = vcmp.ne.s32.totalorder %v468_v39, 255 }
  0x3d   : > { %839 = vperm.xlu1 %1579, %v648_v33   ;;  %836 = vperm.xlu0 %1578, %v647_v35   ;;  %vm1825_vm10 = vmand %vm566_vm9, %vm598_vm4  ;;  %vm596_vm9 = vcmp.lt.s32.totalorder %v468_v39, 4  ;;  %v804_v33 = vmul.f32 0.5, %v1581_v29 }
  0x3e   : > { %v662_v38 = vsel %vm1825_vm10, %v470_v30, 4  ;;  %vm565_vm15 = vmand %vm501_vm5, %vm533_vm12  ;;  %vm532_vm5 = vcmp.ge.s32.totalorder %v468_v39, 0  ;;  %vm499_vm10 = vcmp.ne.s32.totalorder %v467_v41, 255 }
  0x3f   : > { %vm629_vm6 = vmand %vm565_vm15, %vm597_vm0  ;;  %vm595_vm15 = vcmp.lt.s32.totalorder %v467_v41, 4  ;;  %v806_v37 = vadd.f32 0.5, %v804_v33 }
  0x40   : > { %v661_v40 = vsel %vm629_vm6, %v469_v32, 4  ;;  %vm550_vm7 = vmand %vm486_vm2, %vm518_vm3  ;;  %vm531_vm2 = vcmp.ge.s32.totalorder %v467_v41, 0  ;;  %vm484_vm6 = vcmp.ne.s32.totalorder %v452_v47, 255 }
  0x41   : > { %881 = vperm.xlu1 %1579, %v662_v38   ;;  %878 = vperm.xlu0 %1578, %v661_v40   ;;  %vm1839_vm4 = vmand %vm550_vm7, %vm582_vm8  ;;  %vm580_vm7 = vcmp.lt.s32.totalorder %v452_v47, 4  ;;  %v687_v40 = vsub.f32 %v1837_v42, %v1877_v5 }
  0x42   : > { %v646_v46 = vsel %vm1839_vm4, %v454_v34, 4  ;;  %vm549_vm12 = vmand %vm485_vm14, %vm517_vm1  ;;  %vm516_vm14 = vcmp.ge.s32.totalorder %v452_v47, 0  ;;  %vm483_vm4 = vcmp.ne.s32.totalorder %v451_v51, 255 }
  0x43   : > { %vm613_vm0 = vmand %vm549_vm12, %vm581_vm13  ;;  %vm579_vm12 = vcmp.lt.s32.totalorder %v451_v51, 4 }
  0x44   : > { %v645_v50 = vsel %vm613_vm0, %v453_v36, 4  ;;  %vm564_vm3 = vmand %vm500_vm11, %vm532_vm5  ;;  %vm515_vm11 = vcmp.ge.s32.totalorder %v451_v51, 0  ;;  %vm498_vm0 = vcmp.ne.s32.totalorder %v466_v56, 255 }
  0x45   : > { %833 = vperm.xlu1 %1579, %v646_v46   ;;  %830 = vperm.xlu0 %1578, %v645_v50   ;;  %vm1856_vm8 = vmand %vm564_vm3, %vm596_vm9  ;;  %vm594_vm3 = vcmp.lt.s32.totalorder %v466_v56, 4  ;;  %v718_v50 = vsub.s32 1, %v1882_v8 }
  0x46   : > { %v660_v55 = vsel %vm1856_vm8, %v468_v39, 4  ;;  %vm563_vm1 = vmand %vm499_vm10, %vm531_vm2  ;;  %vm530_vm10 = vcmp.ge.s32.totalorder %v466_v56, 0  ;;  %vm497_vm8 = vcmp.ne.s32.totalorder %v465_v61, 255 }
  0x47   : > { %vm627_vm13 = vmand %vm563_vm1, %vm595_vm15  ;;  %vm593_vm1 = vcmp.lt.s32.totalorder %v465_v61, 4 }
  0x48   : > { %v659_v60 = vsel %vm627_vm13, %v467_v41, 4  ;;  %vm548_vm5 = vmand %vm484_vm6, %vm516_vm14  ;;  %vm529_vm6 = vcmp.ge.s32.totalorder %v465_v61, 0  ;;  %vm482_vm13 = vcmp.ne.s32.totalorder %v450_v2, 255  ;;  %v808_v41 = vpack.c.bf16 %v806_v37, %v806_v37 }
  0x49   : > { %875 = vperm.xlu1 %1579, %v660_v55   ;;  %872 = vperm.xlu0 %1578, %v659_v60   ;;  %vm1867_vm9 = vmand %vm548_vm5, %vm580_vm7 }
  0x4a   : > { %v644_v1 = vsel %vm1867_vm9, %v452_v47, 4  ;;  %vm547_vm2 = vmand %vm483_vm4, %vm515_vm11  ;;  %vm514_vm4 = vcmp.ge.s32.totalorder %v450_v2, 0  ;;  %vm770_vm11 = vcmp.eq.f32.partialorder %v1837_v42, %v1877_v5  ;;  %vm769_vm9 = vcmp.eq.f32.partialorder %v1843_v44, %v1884_v9  ;;  %1095 = vmatprep.mubr.bf16.mxu1 %v808_v41 }
  0x4b   : > { %vm611_vm15 = vmand %vm547_vm2, %vm579_vm12  ;;  %vm578_vm12 = vcmp.lt.s32.totalorder %v450_v2, 4  ;;  %v772_v13 = vsel %vm770_vm11, %v1882_v8, 8  ;;  %vm513_vm2 = vcmp.ge.s32.totalorder %v449_v7, 0  ;;  %v771_v15 = vsel %vm769_vm9, %v1882_v8, 8 }
  0x4c   : > { %v643_v6 = vsel %vm611_vm15, %v451_v51, 4  ;;  %vm562_vm14 = vmand %vm498_vm0, %vm530_vm10  ;;  %vm481_vm10 = vcmp.ne.s32.totalorder %v449_v7, 255  ;;  %v782_v14 = vrot.slane %v772_v13, 4  ;;  %vm577_vm15 = vcmp.lt.s32.totalorder %v449_v7, 4  ;;  %v446_v51 = vld [vmem:[%s401_s30] sm:$0x3] }
  0x4d   : > { %827 = vperm.xlu1 %1579, %v644_v1   ;;  %824 = vperm.xlu0 %1578, %v643_v6   ;;  %vm1887_vm7 = vmand %vm562_vm14, %vm594_vm3  ;;  %v773_v18 = vrot.slane %v771_v15, 4  ;;  %vm528_vm14 = vcmp.ge.s32.totalorder %v464_v12, 0  ;;  %v690_v47 = vmul.f32 1.442695, %v687_v40  ;;  %v719_v53 = vrot.slane %v446_v51, %v718_v50  ;;  %s1596_s30 = sshll.u32 %s1703_s18, 4  ;;  %s1597_s30 = int_to_ptr.vmem [resolvable:$false] %s1596_s30 }
  0x4e   : > { %v658_v11 = vsel %vm1887_vm7, %v466_v56, 4  ;;  %vm561_vm5 = vmand %vm497_vm8, %vm529_vm6  ;;  %vm496_vm6 = vcmp.ne.s32.totalorder %v464_v12, 255  ;;  %v715_v54 = vrot.slane %v446_v51, %v714_v52  ;;  %s1598_s8 = scalar_lea.vmem %s1597_s30, 256  ;;  %p1599_p1 = scmp.lt.s32.totalorder %s2053_s20, %s1597_s30 }
  0x4f   : > { %vm625_vm0 = vmand %vm561_vm5, %vm593_vm1  ;;  %vm783_vm1 = vcmp.lt.s32.totalorder %v772_v13, %v782_v14  ;;  %vm495_vm5 = vcmp.ne.s32.totalorder %v463_v17, 255  ;;  %1582 = vpow2.f32 %v690_v47 }
  0x50   : > { %v657_v16 = vsel %vm625_vm0, %v465_v61, 4  ;;  %vm546_vm3 = vmand %vm482_vm13, %vm514_vm4  ;;  %vm592_vm13 = vcmp.lt.s32.totalorder %v464_v12, 4  ;;  %v784_v22 = vsel %vm783_vm1, %v772_v13, %v782_v14  ;;  %vm774_vm4 = vcmp.lt.s32.totalorder %v771_v15, %v773_v18 }
  0x51   : > { %869 = vperm.xlu1 %1579, %v658_v11   ;;  %866 = vperm.xlu0 %1578, %v657_v16   ;;  %vm1906_vm8 = vmand %vm546_vm3, %vm578_vm12  ;;  %vm527_vm12 = vcmp.ge.s32.totalorder %v463_v17, 0  ;;  %v785_v24 = vrot.slane %v784_v22, 2  ;;  %v775_v25 = vsel %vm774_vm4, %v771_v15, %v773_v18  ;;  %vm591_vm0 = vcmp.lt.s32.totalorder %v463_v17, 4 }
  0x52   : > { %v642_v20 = vsel %vm1906_vm8, %v450_v2, 4  ;;  %vm545_vm7 = vmand %vm481_vm10, %vm513_vm2  ;;  %v776_v27 = vrot.slane %v775_v25, 2  ;;  %vm480_vm2 = vcmp.ne.s32.totalorder %v448_v21, 255  ;;  %vm512_vm3 = vcmp.ge.s32.totalorder %v448_v21, 0 }
  0x53   : > { %vm609_vm11 = vmand %vm545_vm7, %vm577_vm15  ;;  %vm576_vm15 = vcmp.lt.s32.totalorder %v448_v21, 4  ;;  %vm786_vm8 = vcmp.lt.s32.totalorder %v784_v22, %v785_v24  ;;  %1584 = vpow2.f32 %v688_v48 }
  0x54   : > { %v641_v26 = vsel %vm609_vm11, %v449_v7, 4  ;;  %vm560_vm9 = vmand %vm496_vm6, %vm528_vm14  ;;  %vm479_vm14 = vcmp.ne.s32.totalorder %v447_v23, 255  ;;  %v787_v31 = vsel %vm786_vm8, %v784_v22, %v785_v24  ;;  %vm777_vm1 = vcmp.lt.s32.totalorder %v775_v25, %v776_v27 }
  0x55   : > { %821 = vperm.xlu1 %1579, %v642_v20   ;;  %818 = vperm.xlu0 %1578, %v641_v26   ;;  %vm1920_vm10 = vmand %vm560_vm9, %vm592_vm13  ;;  %vm511_vm13 = vcmp.ge.s32.totalorder %v447_v23, 0  ;;  %v788_v32 = vrot.slane %v787_v31, 1  ;;  %v778_v34 = vsel %vm777_vm1, %v775_v25, %v776_v27  ;;  %vm575_vm11 = vcmp.lt.s32.totalorder %v447_v23, 4 }
  0x56   : > { %v656_v30 = vsel %vm1920_vm10, %v464_v12, 4  ;;  %vm559_vm6 = vmand %vm495_vm5, %vm527_vm12  ;;  %v779_v36 = vrot.slane %v778_v34, 1  ;;  %v1702_v7 = vmov 0.0   ;;  %vm752_vm1 = vcmask 1040384  }
  0x57   : > { %vm623_vm7 = vmand %vm559_vm6, %vm591_vm0  ;;  %vm789_vm5 = vcmp.lt.s32.totalorder %v787_v31, %v788_v32  ;;  %vm720_vm6 = vcmp.eq.s32.totalorder %v1882_v8, %v715_v54 }
  0x58   : > { %v655_v35 = vsel %vm623_vm7, %v463_v17, 4  ;;  %vm544_vm4 = vmand %vm480_vm2, %vm512_vm3  ;;  %v790_v39 = vsel %vm789_vm5, %v787_v31, %v788_v32  ;;  %vm780_vm0 = vcmp.lt.s32.totalorder %v778_v34, %v779_v36  ;;  %v722_v62 = vsel %vm720_vm6, %v1843_v44, 0.0 }
  0x59   : > { %863 = vperm.xlu1 %1579, %v656_v30   ;;  %860 = vperm.xlu0 %1578, %v655_v35   ;;  %vm608_vm9 = vmand %vm544_vm4, %vm576_vm15  ;;  %vm792_vm8 = vcmp.eq.s32.totalorder %v1882_v8, %v790_v39  ;;  %v1938_v46 = vsel %vm780_vm0, %v778_v34, %v779_v36  ;;  %vm721_vm15 = vcmp.eq.s32.totalorder %v1882_v8, %v719_v53  ;;  %v724_v4 = vrot.slane %v722_v62, 4 }
  0x5a   : > { %v640_v38 = vsel %vm608_vm9, %v448_v21, 4  ;;  %vm543_vm12 = vmand %vm479_vm14, %vm511_vm13  ;;  %vm791_vm3 = vcmp.eq.s32.totalorder %v1882_v8, %v1938_v46  ;;  %v723_v60 = vsel %vm721_vm15, %v1837_v42, 0.0  ;;  %vm671_vm14 = vcmp.ne.s32.totalorder %v446_v51, 255 }
  0x5b   : > { %vm607_vm10 = vmand %vm543_vm12, %vm575_vm11  ;;  %v730_v1 = vrot.slane %v723_v60, 4  ;;  %v1360_v10 = vsel %vm671_vm14, 1.0, %v1702_v7  ;;  %v725_v17 = vadd.f32 %v724_v4, %v722_v62  ;;  %v799_v62 = vmul.f32 0.5, %v1843_v44 }
  0x5c   : > { %v639_v45 = vsel %vm607_vm10, %v447_v23, 4  ;;  %vm1427_vm2 = vmpackc.low %vm792_vm8, %vm792_vm8  ;;  %v1583_v55 = vpop.eup %1582  ;;  %v743_v15 = vrot.slane %v1360_v10, %v714_v52  ;;  %v747_v42 = vrot.slane %v1360_v10, %v718_v50 }
  0x5d   : > { %815 = vperm.xlu1 %1579, %v640_v38   ;;  %812 = vperm.xlu0 %1578, %v639_v45   ;;  %v698_v57 = vrot.slane %v1583_v55, 4  ;;  %v731_v14 = vadd.f32 %v730_v1, %v723_v60  ;;  %v726_v21 = vrot.slane %v725_v17, 2  ;;  %v1961_v45 = vand.u32 127, %v710_v3 }
  0x5e   : > { %1428 = vmatprep.mubr.msk.bf16.mxu0 %vm1427_vm2, %v1701_v49  ;;  %v762_v18 = vsel %vm752_vm1, %v743_v15, 0.0  ;;  %v763_v19 = vsel %vm752_vm1, %v747_v42, 0.0 }
  0x5f   : > { %v699_v59 = vadd.f32 %v1583_v55, %v698_v57  ;;  %v732_v20 = vrot.slane %v731_v14, 2  ;;  %v764_v22 = vadd.f32 %v763_v19, %v762_v18  ;;  %v727_v24 = vadd.f32 %v726_v21, %v725_v17 }
  0x60   : > { %v1585_v56 = vpop.eup %1584 }
  0x61   : > { %v692_v58 = vrot.slane %v1585_v56, 4  ;;  %v700_v63 = vrot.slane %v699_v59, 2  ;;  %v733_v23 = vadd.f32 %v732_v20, %v731_v14  ;;  %v728_v26 = vrot.slane %v727_v24, 1 }
  0x63   : > { %v693_v61 = vadd.f32 %v1585_v56, %v692_v58  ;;  %v701_v2 = vadd.f32 %v700_v63, %v699_v59  ;;  %v734_v25 = vrot.slane %v733_v23, 1  ;;  %v729_v32 = vadd.f32 %v728_v26, %v727_v24 }
  0x65   : > { %v694_v0 = vrot.slane %v693_v61, 2  ;;  %v702_v11 = vrot.slane %v701_v2, 1  ;;  %v735_v30 = vadd.f32 %v734_v25, %v733_v23 }
  0x67   : > { %v695_v6 = vadd.f32 %v694_v0, %v693_v61  ;;  %v703_v13 = vadd.f32 %v702_v11, %v701_v2 }
  0x69   : > { %v696_v12 = vrot.slane %v695_v6, 1  ;;  %1586 = vlog2.f32 %v703_v13 }
  0x6b   : > { %v697_v16 = vadd.f32 %v696_v12, %v695_v6 }
  0x6d   : > { %1588 = vlog2.f32 %v697_v16 }
  0x6e   : > { %1590 = vtanh.f32 %v799_v62 }
  0x76   : > { %v1587_v27 = vpop.eup %1586 }
  0x77   : > { %v707_v29 = vmul.f32 0.6931472, %v1587_v27 }
  0x79   : > { %v709_v33 = vadd.f32 %v707_v29, %v1877_v5 }
  0x7a   : > { %v1589_v28 = vpop.eup %1588 }
  0x7b   : > { %v705_v31 = vmul.f32 0.6931472, %v1589_v28  ;;  %v738_v35 = vsub.f32 %v709_v33, %v735_v30  ;;  %v1591_v11 = vpop.eup %1590 }
  0x7c   : > { %v803_v14 = vmul.f32 0.5, %v1591_v11 }
  0x7d   : > { %v708_v34 = vadd.f32 %v705_v31, %v1884_v9  ;;  %v751_v37 = vmul.f32 %v747_v42, %v738_v35 }
  0x7e   : > { %v805_v16 = vadd.f32 0.5, %v803_v14 }
  0x7f   : > { %v737_v36 = vsub.f32 %v708_v34, %v729_v32  ;;  %v754_v39 = vsel %vm752_vm1, %v751_v37, 0.0 }
  0x80   : > { %v807_v19 = vpack.c.bf16 %v805_v16, %v805_v16 }
  0x81   : > { %765 = vadd.xlane.f32.xlu1 %v764_v22  ;;  %v750_v38 = vmul.f32 %v743_v15, %v737_v36 }
  0x83   : > { %v753_v40 = vsel %vm752_vm1, %v750_v38, 0.0 }
  0x84   : > { %v755_v41 = vadd.f32 %v754_v39, %v753_v40 }
  0x86   : > { %756 = vadd.xlane.f32.xlu0 %v755_v41 }
  0x9a   : > { %v903_v43 = vpop.permute.xlu0 %902 }
  0x9b   : > { %vm937_vm7 = vcmp.eq.s32.totalorder %v1961_v45, %v903_v43 }
  0x9c   : > { %v855_v47 = vpop.permute.xlu1 %854 }
  0x9d   : > { %vm921_vm11 = vcmp.eq.s32.totalorder %v1961_v45, %v855_v47 }
  0x9e   : > { %v906_v48 = vpop.permute.xlu0 %905 }
  0x9f   : > { %vm938_vm13 = vcmp.eq.s32.totalorder %v1961_v45, %v906_v48 }
  0xa0   : > { %v858_v5 = vpop.permute.xlu1 %857  ;;  %vm1411_vm4 = vmpackc.low %vm938_vm13, %vm937_vm7 }
  0xa1   : > { %vm922_vm9 = vcmp.eq.s32.totalorder %v1961_v45, %v858_v5  ;;  %1471 = vmatprep.subr.msk.bf16.mxu0 %vm1411_vm4, %v1701_v49  ;;  %1493 = vmatprep.subr.msk.bf16.mxu1 %vm1411_vm4, %v1701_v49 }
  0xa2   : > { %vm1395_vm5 = vmpackc.low %vm922_vm9, %vm921_vm11  ;;  %v897_v9 = vpop.permute.xlu0 %896 }
  0xa3   : > { %vm935_vm12 = vcmp.eq.s32.totalorder %v1961_v45, %v897_v9  ;;  %1472 = vmatpush3.bf16.msk.msra.mxu0 %vm1395_vm5, %v1701_v49  ;;  %1494 = vmatpush3.bf16.msk.msra.mxu1 %vm1395_vm5, %v1701_v49 }
  0xa4   : > { %v900_v3 = vpop.permute.xlu1 %899 }
  0xa5   : > { %vm936_vm0 = vcmp.eq.s32.totalorder %v1961_v45, %v900_v3 }
  0xa6   : > { %vm1413_vm10 = vmpackc.low %vm936_vm0, %vm935_vm12 }
  0xa7   : > { %1473 = vmatprep.subr.msk.bf16.mxu0 %vm1413_vm10, %v1701_v49  ;;  %1495 = vmatprep.subr.msk.bf16.mxu1 %vm1413_vm10, %v1701_v49 }
  0xa8   : > { %v852_v50 = vpop.permute.xlu1 %851  ;;  %v849_v51 = vpop.permute.xlu0 %848 }
  0xa9   : > { %vm920_vm8 = vcmp.eq.s32.totalorder %v1961_v45, %v852_v50  ;;  %vm919_vm2 = vcmp.eq.s32.totalorder %v1961_v45, %v849_v51 }
  0xaa   : > { %vm1397_vm15 = vmpackc.low %vm920_vm8, %vm919_vm2 }
  0xab   : > { %1474 = vmatpush3.bf16.msk.msra.mxu0 %vm1397_vm15, %v1701_v49  ;;  %1496 = vmatpush3.bf16.msk.msra.mxu1 %vm1397_vm15, %v1701_v49 }
  0xac   : > { %v894_v52 = vpop.permute.xlu1 %893  ;;  %v891_v53 = vpop.permute.xlu0 %890 }
  0xad   : > { %vm934_vm6 = vcmp.eq.s32.totalorder %v1961_v45, %v894_v52  ;;  %vm933_vm14 = vcmp.eq.s32.totalorder %v1961_v45, %v891_v53 }
  0xae   : > { %vm1415_vm1 = vmpackc.low %vm934_vm6, %vm933_vm14 }
  0xaf   : > { %1475 = vmatprep.subr.msk.bf16.mxu0 %vm1415_vm1, %v1701_v49  ;;  %1497 = vmatprep.subr.msk.bf16.mxu1 %vm1415_vm1, %v1701_v49 }
  0xb0   : > { %v846_v54 = vpop.permute.xlu1 %845  ;;  %v843_v55 = vpop.permute.xlu0 %842 }
  0xb1   : > { %vm918_vm7 = vcmp.eq.s32.totalorder %v1961_v45, %v846_v54  ;;  %vm917_vm13 = vcmp.eq.s32.totalorder %v1961_v45, %v843_v55 }
  0xb2   : > { %vm1399_vm4 = vmpackc.low %vm918_vm7, %vm917_vm13 }
  0xb3   : > { %1476 = vmatpush3.bf16.msk.msra.mxu0 %vm1399_vm4, %v1701_v49  ;;  %1498 = vmatpush3.bf16.msk.msra.mxu1 %vm1399_vm4, %v1701_v49 }
  0xb4   : > { %v888_v56 = vpop.permute.xlu1 %887  ;;  %v885_v57 = vpop.permute.xlu0 %884 }
  0xb5   : > { %vm932_vm11 = vcmp.eq.s32.totalorder %v1961_v45, %v888_v56  ;;  %vm931_vm9 = vcmp.eq.s32.totalorder %v1961_v45, %v885_v57 }
  0xb6   : > { %vm1417_vm5 = vmpackc.low %vm932_vm11, %vm931_vm9 }
  0xb7   : > { %1477 = vmatprep.subr.msk.bf16.mxu0 %vm1417_vm5, %v1701_v49  ;;  %1499 = vmatprep.subr.msk.bf16.mxu1 %vm1417_vm5, %v1701_v49 }
  0xb8   : > { %v840_v58 = vpop.permute.xlu1 %839  ;;  %v837_v59 = vpop.permute.xlu0 %836 }
  0xb9   : > { %vm916_vm12 = vcmp.eq.s32.totalorder %v1961_v45, %v840_v58  ;;  %vm915_vm0 = vcmp.eq.s32.totalorder %v1961_v45, %v837_v59 }
  0xba   : > { %vm1401_vm10 = vmpackc.low %vm916_vm12, %vm915_vm0 }
  0xbb   : > { %1478 = vmatpush3.bf16.msk.msra.mxu0 %vm1401_vm10, %v1701_v49  ;;  %1500 = vmatpush3.bf16.msk.msra.mxu1 %vm1401_vm10, %v1701_v49 }
  0xbc   : > { %v882_v60 = vpop.permute.xlu1 %881  ;;  %v879_v61 = vpop.permute.xlu0 %878 }
  0xbd   : > { %vm930_vm8 = vcmp.eq.s32.totalorder %v1961_v45, %v882_v60  ;;  %vm929_vm2 = vcmp.eq.s32.totalorder %v1961_v45, %v879_v61 }
  0xbe   : > { %vm1419_vm15 = vmpackc.low %vm930_vm8, %vm929_vm2 }
  0xbf   : > { %1479 = vmatprep.subr.msk.bf16.mxu0 %vm1419_vm15, %v1701_v49  ;;  %1501 = vmatprep.subr.msk.bf16.mxu1 %vm1419_vm15, %v1701_v49 }
  0xc0   : > { %v834_v63 = vpop.permute.xlu1 %833  ;;  %v831_v0 = vpop.permute.xlu0 %830 }
  0xc1   : > { %vm914_vm6 = vcmp.eq.s32.totalorder %v1961_v45, %v834_v63  ;;  %vm913_vm14 = vcmp.eq.s32.totalorder %v1961_v45, %v831_v0 }
  0xc2   : > { %vm1403_vm1 = vmpackc.low %vm914_vm6, %vm913_vm14 }
  0xc3   : > { %1480 = vmatpush3.bf16.msk.msra.mxu0 %vm1403_vm1, %v1701_v49  ;;  %1502 = vmatpush3.bf16.msk.msra.mxu1 %vm1403_vm1, %v1701_v49 }
  0xc4   : > { %v876_v1 = vpop.permute.xlu1 %875  ;;  %v873_v2 = vpop.permute.xlu0 %872 }
  0xc5   : > { %vm928_vm7 = vcmp.eq.s32.totalorder %v1961_v45, %v876_v1  ;;  %vm927_vm13 = vcmp.eq.s32.totalorder %v1961_v45, %v873_v2 }
  0xc6   : > { %vm1421_vm4 = vmpackc.low %vm928_vm7, %vm927_vm13 }
  0xc7   : > { %1481 = vmatprep.subr.msk.bf16.mxu0 %vm1421_vm4, %v1701_v49  ;;  %1503 = vmatprep.subr.msk.bf16.mxu1 %vm1421_vm4, %v1701_v49 }
  0xc8   : > { %v828_v44 = vpop.permute.xlu1 %827  ;;  %v825_v4 = vpop.permute.xlu0 %824 }
  0xc9   : > { %vm912_vm11 = vcmp.eq.s32.totalorder %v1961_v45, %v828_v44  ;;  %vm911_vm9 = vcmp.eq.s32.totalorder %v1961_v45, %v825_v4 }
  0xca   : > { %vm1405_vm5 = vmpackc.low %vm912_vm11, %vm911_vm9  ;;  %vm441_vm9 = vcmask 0  }
  0xcb   : > { %1482 = vmatpush3.bf16.msk.msra.mxu0 %vm1405_vm5, %v1701_v49  ;;  %1504 = vmatpush3.bf16.msk.msra.mxu1 %vm1405_vm5, %v1701_v49  ;;  %vm1429_vm11 = vmpackc.low %vm791_vm3, %vm791_vm3  ;;  %443 = vst.msk [vmem:[%s431_s13] sm:$0x1] %vm441_vm9, %v1702_v7 }
  0xcc   : > { %v870_v6 = vpop.permute.xlu1 %869  ;;  %v867_v10 = vpop.permute.xlu0 %866  ;;  %442 = vst.msk [vmem:[%s424_s16] sm:$0x1] %vm441_vm9, %v1702_v7 }
  0xcd   : > { %vm926_vm12 = vcmp.eq.s32.totalorder %v1961_v45, %v870_v6  ;;  %vm925_vm0 = vcmp.eq.s32.totalorder %v1961_v45, %v867_v10 }
  0xce   : > { %vm1423_vm10 = vmpackc.low %vm926_vm12, %vm925_vm0 }
  0xcf   : > { %1483 = vmatprep.subr.msk.bf16.mxu0 %vm1423_vm10, %v1701_v49  ;;  %1505 = vmatprep.subr.msk.bf16.mxu1 %vm1423_vm10, %v1701_v49 }
  0xd0   : > { %v822_v12 = vpop.permute.xlu1 %821  ;;  %v819_v13 = vpop.permute.xlu0 %818 }
  0xd1   : > { %vm910_vm8 = vcmp.eq.s32.totalorder %v1961_v45, %v822_v12  ;;  %vm909_vm2 = vcmp.eq.s32.totalorder %v1961_v45, %v819_v13 }
  0xd2   : > { %vm1407_vm15 = vmpackc.low %vm910_vm8, %vm909_vm2  ;;  %v761_v8 = vld [vmem:[%s431_s13] sm:$0x1] }
  0xd3   : > { %1484 = vmatpush3.bf16.msk.msra.mxu0 %vm1407_vm15, %v1701_v49  ;;  %1506 = vmatpush3.bf16.msk.msra.mxu1 %vm1407_vm15, %v1701_v49  ;;  %v736_v20 = vld [vmem:[%s424_s16] sm:$0x1] }
  0xd4   : > { %v864_v15 = vpop.permute.xlu1 %863  ;;  %v861_v42 = vpop.permute.xlu0 %860 }
  0xd5   : > { %vm924_vm6 = vcmp.eq.s32.totalorder %v1961_v45, %v864_v15  ;;  %vm923_vm14 = vcmp.eq.s32.totalorder %v1961_v45, %v861_v42 }
  0xd6   : > { %vm1425_vm1 = vmpackc.low %vm924_vm6, %vm923_vm14 }
  0xd7   : > { %1485 = vmatprep.subr.msk.bf16.mxu0 %vm1425_vm1, %v1701_v49  ;;  %1507 = vmatprep.subr.msk.bf16.mxu1 %vm1425_vm1, %v1701_v49 }
  0xd8   : > { %v816_v17 = vpop.permute.xlu1 %815  ;;  %v813_v18 = vpop.permute.xlu0 %812 }
  0xd9   : > { %vm908_vm7 = vcmp.eq.s32.totalorder %v1961_v45, %v816_v17  ;;  %vm907_vm13 = vcmp.eq.s32.totalorder %v1961_v45, %v813_v18 }
  0xda   : > { %vm1409_vm4 = vmpackc.low %vm908_vm7, %vm907_vm13 }
  0xdb   : > { %1486 = vmatpush3.bf16.msk.msra.mxu0 %vm1409_vm4, %v1701_v49  ;;  %1508 = vmatpush3.bf16.msk.msra.mxu1 %vm1409_vm4, %v1701_v49 }
  0xde   : > { %1430 = vmatmul.mubr.msk.bf16.vlgmr.msra.gmra.mxu0 %vm1429_vm11, %v1701_v49  ;;  %1096 = vmatmul.mubr.bf16.vlgmr.msra.gmra.mxu1 %v807_v19 }
 0x10a   : > { %v766_v46 = vpop.xlane.xlu1 %765 }
 0x10b   : > { %v767_v49 = vadd.f32 %v766_v46, %v761_v8 }
 0x10d   : > { %768 = vst.msk [vmem:[%s431_s13] sm:$0x1] %vm441_vm9, %v767_v49 }
 0x10f   : > { %v757_v21 = vpop.xlane.xlu0 %756 }
 0x110   : > { %v758_v22 = vadd.f32 %v757_v21, %v736_v20 }
 0x112   : > { %760 = vst.msk [vmem:[%s424_s16] sm:$0x1] %vm441_vm9, %v758_v22  ;;  %s1592_s16 = scalar_lea.vmem %s2053_s20, 128 }
 0x113   : > { %p1593_p12 = scmp.ne.s32.totalorder %s2053_s20, %s1592_s16  ;;  %p1600_p2 = scmp.lt.s32.totalorder %s1598_s8, %s1592_s16 }
 0x115   : > { %p1594_p13 = pnand %p1593_p12, %p1780_p4  ;;  %p1601_p3 = por %p1600_p2, %p1599_p1 }
 0x117   : > { %p1595_p0 = pneg %p1594_p13 }
 0x119   : > { %p1602_p5 = pnand %p1601_p3, %p1595_p0 }
 0x19e   : > { %v1487_v23 = vpop.f32.mrf.mxu0  ;;  %v1509_v24 = vpop.f32.mrf.mxu1 }
 0x1a0   : > { %v1488_v25 = vpop.f32.mrf.mxu0  ;;  %v1510_v26 = vpop.f32.mrf.mxu1 }
 0x1a1   : > { %v1489_v7 = vadd.f32 %v1488_v25, %v1487_v23  ;;  %v1511_v27 = vadd.f32 %v1510_v26, %v1509_v24 }
 0x1a2   : > { %v1490_v28 = vpop.f32.mrf.mxu0  ;;  %v1512_v29 = vpop.f32.mrf.mxu1 }
 0x1a3   : > { %1061 = vst [vmem:[%s359_s11] sm:$0xff] %v1489_v7  ;;  %1104 = vst [vmem:[%s366_s27] sm:$0xff] %v1511_v27 }
 0x1a4   : > { %v1491_v30 = vpop.f32.mrf.mxu0  ;;  %v1513_v31 = vpop.f32.mrf.mxu1 }
 0x1a5   : > { %1605 = shalt.err (!%p1602_p5)
}
 0x1a6   : > { %s1606_s19 = scalar_lea.hbm %s2051_s12, 128  ;;  %s1610_s24 = scalar_lea.hbm %s2129_s3, 256 }
 0x1a7   : > { %p1607_p6 = scmp.ne.s32.totalorder %s2051_s12, %s1606_s19  ;;  %p1611_p10 = scmp.lt.s32.totalorder %s2051_s12, %s2129_s3 }
 0x1a8   : > { %p1612_p11 = scmp.lt.s32.totalorder %s1610_s24, %s1606_s19 }
 0x1a9   : > { %p1608_p7 = pnand %p1607_p6, %p1780_p4 }
 0x1aa   : > { %p1613_p12 = por %p1612_p11, %p1611_p10 }
 0x1ab   : > { %p1609_p9 = pneg %p1608_p7 }
 0x1ad   : > { %p1614_p13 = pnand %p1613_p12, %p1609_p9 }
 0x1af   : > { %1617 = shalt.err (!%p1614_p13)
}
 0x1b0   : > { %1515 = dma.vmem_to_hbm [thread:$0]  (%p1780_p4), %s2053_s20, 128, %s2051_s12, %s1106_s15  }
 0x1b1   : > { %s1111_s16 = scalar_lea.sflag [#allocation5], %s2044_s17  ;;  %s1618_s30 = scalar_lea.vmem %s2060_s28, 128 }
 0x1b2   : > { %p1619_p0 = scmp.ne.s32.totalorder %s2060_s28, %s1618_s30  ;;  %s1704_s8 = smov [#allocation4]  }
 0x1b3   : > { %s1622_s19 = sshll.u32 %s1704_s8, 4  ;;  %s1623_s19 = int_to_ptr.vmem [resolvable:$false] %s1622_s19 }
 0x1b4   : > { %p1620_p1 = pnand %p1619_p0, %p1780_p4  ;;  %s1624_s11 = scalar_lea.vmem %s1623_s19, 256 }
 0x1b5   : > { %p1625_p3 = scmp.lt.s32.totalorder %s2060_s28, %s1623_s19  ;;  %p1626_p5 = scmp.lt.s32.totalorder %s1624_s11, %s1618_s30 }
 0x1b6   : > { %p1621_p2 = pneg %p1620_p1 }
 0x1b7   : > { %p1627_p6 = por %p1626_p5, %p1625_p3 }
 0x1b9   : > { %p1628_p7 = pnand %p1627_p6, %p1621_p2 }
 0x1bb   : > { %1631 = shalt.err (!%p1628_p7)
}
 0x1bc   : > { %s1632_s20 = scalar_lea.hbm %s2058_s14, 128  ;;  %s1636_s15 = scalar_lea.hbm %s2130_s4, 256 }
 0x1bd   : > { %p1633_p9 = scmp.ne.s32.totalorder %s2058_s14, %s1632_s20  ;;  %p1637_p12 = scmp.lt.s32.totalorder %s2058_s14, %s2130_s4 }
 0x1be   : > { %p1638_p13 = scmp.lt.s32.totalorder %s1636_s15, %s1632_s20 }
 0x1bf   : > { %p1634_p10 = pnand %p1633_p9, %p1780_p4 }
 0x1c0   : > { %p1639_p0 = por %p1638_p13, %p1637_p12 }
 0x1c1   : > { %p1635_p11 = pneg %p1634_p10 }
 0x1c3   : > { %p1640_p1 = pnand %p1639_p0, %p1635_p11 }
 0x1c5   : > { %1643 = shalt.err (!%p1640_p1)
}
 0x1c6   : > { %1516 = dma.vmem_to_hbm [thread:$0]  (%p1780_p4), %s2060_s28, 128, %s2058_s14, %s1111_s16  }
 0x1c7 PF: > { %p1526_p2 = scmp.ge.s32.totalorder %s1698_s26, 2  ;;  %s1173_s13 = sand.u32 1, %s1678_s21  }
 0x1c8   : > { %s1174_s18 = scalar_lea.sflag [#allocation3], %s1173_s13 }
 0x1c9   : > { %p1520_p3 = pnand %p1526_p2, %p1787_p8 }
 0x1cb   : > { %p1521_p5 = pneg %p1520_p3 }
 0x1cd   : > { %1669 = dma.done.wait (%p1521_p5), %s1174_s18, 128  }
 0x1ce   : > { %1671 = vsyncadd (%p1521_p5), %s1174_s18, 4294967168  ;;  %s1183_s30 = scalar_lea.sflag [#allocation5], %s1173_s13 }
 0x1cf   : > { %1673 = dma.done.wait (%p1521_p5), %s1183_s30, 128  }
 0x1d0   : > { %1675 = vsyncadd (%p1521_p5), %s1183_s30, 4294967168  ;;  %s23_s26 = sadd.s32 1, %s1698_s26   ;;  %s2149_s21 = smov %s1682_s22 }
 0x1d1   : > { %p20_p6 = scmp.ge.s32.totalorder %s23_s26, 4   ;;  %s2150_s22 = smov %s1686_s23 }
 0x1d2   : > { %s2151_s23 = smov %s1793_s10  ;;  %s2152_s24 = smov %s1694_s25 }
 0x1d3   : > { %s2153_s25 = smov %s2155_s29  ;;  %22 = sbr.rel (!%p20_p6) target bundleno = 6 (0x6), region = 118 }
 0x1d8   :  { %1204 = vsyncpa [#allocation3], 1 }
 0x1d9   :  { %1206 = vsyncpa [#allocation3 + $0x1], 1 }
 0x1da   :  { %1207 = vsyncpa [#allocation5], 1 }
 0x1db   :  { %1209 = vsyncpa [#allocation5 + $0x1], 1 }

</bundles_post_ra>
